<compile_context>
chip_gen: v5e
topology: v5e:2x2
jax: 0.10.0
libtpu: 0.0.40
codegen_flags: <defaults>
</compile_context>

<pallas_src>
import functools

import jax
import jax.numpy as jnp
from jax.experimental import pallas as pl
from jax.experimental.pallas import tpu as pltpu

BN_EPS = 1e-5


def _linear_bn_act_kernel(x_ref, w_ref, gamma_ref, beta_ref, o_ref, acc_ref,
                          *, apply_relu):
    """Fused (bias-free) Linear -> BatchNorm1d(train) -> optional ReLU for one output tile."""
    k = pl.program_id(1)

    @pl.when(k == 0)
    def _():
        acc_ref[...] = jnp.zeros_like(acc_ref)

    # bf16 x bf16 -> f32 accumulation on the MXU.
    acc_ref[...] += jnp.dot(x_ref[...], w_ref[...],
                            preferred_element_type=jnp.float32)

    @pl.when(k == pl.num_programs(1) - 1)
    def _():
        h = acc_ref[...]                                   # (N, TN), f32
        inv_n = 1.0 / h.shape[0]
        # Single-pass per-feature batch statistics (biased variance, PyTorch train mode).
        mean = jnp.sum(h, axis=0, keepdims=True) * inv_n           # (1, TN)
        mean_sq = jnp.sum(h * h, axis=0, keepdims=True) * inv_n
        var = mean_sq - mean * mean
        inv_std = jax.lax.rsqrt(var + BN_EPS)
        y = (h - mean) * (inv_std * gamma_ref[...]) + beta_ref[...]
        if apply_relu:
            y = jnp.maximum(y, 0.0)
        o_ref[...] = y.astype(o_ref.dtype)                 # lane-dense store (TN % 128 == 0)


def linear_bn_act(x, w, gamma, beta, *, apply_relu, out_dtype, tk=128, tn=128):
    """One fused Linear(no bias) -> BatchNorm1d(training) -> optional ReLU layer."""
    n, k_dim = x.shape
    k_dim_w, n_dim = w.shape
    assert k_dim == k_dim_w
    tk = min(tk, k_dim)
    tn = min(tn, n_dim)
    assert k_dim % tk == 0 and n_dim % tn == 0

    kernel = functools.partial(_linear_bn_act_kernel, apply_relu=apply_relu)
    return pl.pallas_call(
        kernel,
        out_shape=jax.ShapeDtypeStruct((n, n_dim), out_dtype),
        grid_spec=pltpu.PrefetchScalarGridSpec(
            num_scalar_prefetch=0,
            grid=(n_dim // tn, k_dim // tk),               # (out-feature tiles, K tiles)
            in_specs=[
                pl.BlockSpec((n, tk), lambda j, k: (0, k)),    # x: streamed over K
                pl.BlockSpec((tk, tn), lambda j, k: (k, j)),   # W: streamed over (K, out)
                pl.BlockSpec((1, tn), lambda j, k: (0, j)),    # gamma (f32)
                pl.BlockSpec((1, tn), lambda j, k: (0, j)),    # beta  (f32)
            ],
            out_specs=pl.BlockSpec((n, tn), lambda j, k: (0, j)),
            scratch_shapes=[pltpu.VMEM((n, tn), jnp.float32)],  # f32 accumulator
        ),
        compiler_params=pltpu.CompilerParams(
            dimension_semantics=("parallel", "arbitrary"),
        ),
    )(x, w, gamma, beta)


def projection_mlp_forward(x, w1, lb1, g1, bt1, w2, lb2, g2, bt2, w3, lb3, g3, bt3,
                           *, tk=128, tn=128):
    """3-layer projection MLP forward. Weights are (K, N_out) (transposed vs PyTorch).

    The nn.Linear biases lb1/lb2/lb3 are accepted for interface parity but are not
    used: training-mode BatchNorm subtracts the batch mean right after each Linear,
    so the bias cancels exactly.
    """
    del lb1, lb2, lb3
    bf16 = jnp.bfloat16
    h = linear_bn_act(x.astype(bf16), w1.astype(bf16), g1, bt1,
                      apply_relu=True, out_dtype=bf16, tk=tk, tn=tn)
    h = linear_bn_act(h, w2.astype(bf16), g2, bt2,
                      apply_relu=True, out_dtype=bf16, tk=tk, tn=tn)
    y = linear_bn_act(h, w3.astype(bf16), g3, bt3,
                      apply_relu=False, out_dtype=jnp.float32, tk=tk, tn=tn)
    return y


# ----------------------------- references (for the self-test) -----------------------------

def reference_forward_f32(x, w1, lb1, g1, bt1, w2, lb2, g2, bt2, w3, lb3, g3, bt3):
    """Exact f32 PyTorch-semantics reference (includes Linear biases)."""
    def layer(h, w, lb, g, bt, relu):
        h = h @ w + lb
        mean = jnp.mean(h, axis=0, keepdims=True)
        var = jnp.mean((h - mean) ** 2, axis=0, keepdims=True)
        h = (h - mean) * jax.lax.rsqrt(var + BN_EPS) * g + bt
        return jnp.maximum(h, 0.0) if relu else h
    h = layer(x, w1, lb1, g1, bt1, True)
    h = layer(h, w2, lb2, g2, bt2, True)
    return layer(h, w3, lb3, g3, bt3, False)


def reference_forward_bf16(x, w1, g1, bt1, w2, g2, bt2, w3, g3, bt3):
    """Reference mirroring the kernel's numerics (bf16 matmul operands, f32 acc/BN)."""
    def layer(h, w, g, bt, relu, out_dtype):
        hw = jnp.dot(h.astype(jnp.bfloat16), w.astype(jnp.bfloat16),
                     preferred_element_type=jnp.float32)
        mean = jnp.mean(hw, axis=0, keepdims=True)
        mean_sq = jnp.mean(hw * hw, axis=0, keepdims=True)
        var = mean_sq - mean * mean
        y = (hw - mean) * jax.lax.rsqrt(var + BN_EPS) * g + bt
        if relu:
            y = jnp.maximum(y, 0.0)
        return y.astype(out_dtype)
    h = layer(x, w1, g1, bt1, True, jnp.bfloat16)
    h = layer(h, w2, g2, bt2, True, jnp.bfloat16)
    return layer(h, w3, g3, bt3, False, jnp.float32)


if __name__ == "__main__":
    # Small, TPU-tile-friendly shapes (SimSiam default has in_dim == hidden == out_dim,
    # 2048 scaled down to 256; batch scaled down to 64). 128x128 tiles -> 2x2 grid/layer.
    N, IN_DIM, HIDDEN, OUT_DIM = 64, 256, 256, 256

    key = jax.random.PRNGKey(0)
    ks = jax.random.split(key, 13)

    x = jax.random.normal(ks[0], (N, IN_DIM), dtype=jnp.float32)

    def linear_init(kw, kb, fan_in, fan_out):
        lim = 1.0 / jnp.sqrt(fan_in)
        w = jax.random.uniform(kw, (fan_in, fan_out), jnp.float32, -lim, lim)
        b = jax.random.uniform(kb, (1, fan_out), jnp.float32, -lim, lim)
        return w, b

    w1, lb1 = linear_init(ks[1], ks[2], IN_DIM, HIDDEN)
    w2, lb2 = linear_init(ks[3], ks[4], HIDDEN, HIDDEN)
    w3, lb3 = linear_init(ks[5], ks[6], HIDDEN, OUT_DIM)

    # Non-trivial (but deterministic) BN affine params so gamma/beta paths are exercised.
    g1 = 1.0 + 0.1 * jax.random.normal(ks[7], (1, HIDDEN), jnp.float32)
    bt1 = 0.1 * jax.random.normal(ks[8], (1, HIDDEN), jnp.float32)
    g2 = 1.0 + 0.1 * jax.random.normal(ks[9], (1, HIDDEN), jnp.float32)
    bt2 = 0.1 * jax.random.normal(ks[10], (1, HIDDEN), jnp.float32)
    g3 = 1.0 + 0.1 * jax.random.normal(ks[11], (1, OUT_DIM), jnp.float32)
    bt3 = 0.1 * jax.random.normal(ks[12], (1, OUT_DIM), jnp.float32)

    out = projection_mlp_forward(x, w1, lb1, g1, bt1, w2, lb2, g2, bt2, w3, lb3, g3, bt3)
    out = jax.block_until_ready(out)
    assert out.shape == (N, OUT_DIM)
    assert out.dtype == jnp.float32

    # Tight check against a reference that mirrors the kernel's numerics exactly.
    ref_bf16 = reference_forward_bf16(x, w1, g1, bt1, w2, g2, bt2, w3, g3, bt3)
    assert jnp.allclose(out, ref_bf16, atol=5e-3, rtol=5e-3)

    # Semantic check against the exact f32 PyTorch-style forward (biases included);
    # looser tolerance covers the intended bf16 MXU precision.
    ref_f32 = reference_forward_f32(x, w1, lb1, g1, bt1, w2, lb2, g2, bt2, w3, lb3, g3, bt3)
    assert jnp.allclose(out, ref_f32, atol=1e-1, rtol=1e-1)

    print("KERNEL_OK")
</pallas_src>

<mosaic_0001>
module attributes {stable_mosaic.version = 11 : i64} {
  func.func @_linear_bn_act_kernel(%arg0: i32, %arg1: i32, %arg2: memref<64x128xbf16, #tpu.memory_space<vmem>>, %arg3: memref<128x128xbf16, #tpu.memory_space<vmem>>, %arg4: memref<1x128xf32, #tpu.memory_space<vmem>>, %arg5: memref<1x128xf32, #tpu.memory_space<vmem>>, %arg6: memref<64x128xbf16, #tpu.memory_space<vmem>>, %arg7: memref<64x128xf32, #tpu.memory_space<vmem>>) attributes {dimension_semantics = [#tpu.dimension_semantics<parallel>, #tpu.dimension_semantics<arbitrary>], iteration_bounds = array<i64: 2, 2>, scalar_prefetch = 0 : i64, scratch_operands = 1 : i64, tpu.core_type = #tpu.core_type<tc>, window_params = [{transform_indices = @transform_0, window_bounds = array<i64: 64, 128>}, {transform_indices = @transform_1, window_bounds = array<i64: 128, 128>}, {transform_indices = @transform_2, window_bounds = array<i64: 1, 128>}, {transform_indices = @transform_3, window_bounds = array<i64: 1, 128>}, {transform_indices = @transform_4, window_bounds = array<i64: 64, 128>}]} {
    %c0_i32 = arith.constant 0 : i32
    %0 = arith.cmpi eq, %arg1, %c0_i32 : i32
    %1 = arith.extui %0 : i1 to i32
    %c0_i32_0 = arith.constant 0 : i32
    %2 = arith.cmpi ne, %1, %c0_i32_0 : i32
    scf.if %2 {
      %cst_9 = arith.constant 0.000000e+00 : f32
      %12 = vector.broadcast %cst_9 : f32 to vector<64x128xf32>
      %c0_10 = arith.constant 0 : index
      %c0_11 = arith.constant 0 : index
      %13 = vector.load %arg7[%c0_10, %c0_11] : memref<64x128xf32, #tpu.memory_space<vmem>>, vector<64x128xf32>
      tpu.vector_store %arg7[%c0_10, %c0_11], %12 {strides = array<i32>} : memref<64x128xf32, #tpu.memory_space<vmem>>, vector<64x128xf32>,
    } else {
    }
    %c0 = arith.constant 0 : index
    %c0_1 = arith.constant 0 : index
    %3 = vector.load %arg7[%c0, %c0_1] : memref<64x128xf32, #tpu.memory_space<vmem>>, vector<64x128xf32>
    %c0_2 = arith.constant 0 : index
    %c0_3 = arith.constant 0 : index
    %4 = vector.load %arg2[%c0_2, %c0_3] : memref<64x128xbf16, #tpu.memory_space<vmem>>, vector<64x128xbf16>
    %c0_4 = arith.constant 0 : index
    %c0_5 = arith.constant 0 : index
    %5 = vector.load %arg3[%c0_4, %c0_5] : memref<128x128xbf16, #tpu.memory_space<vmem>>, vector<128x128xbf16>
    %cst = arith.constant dense<0.000000e+00> : vector<64x128xf32>
    %6 = tpu.matmul %4, %5, %cst {dimension_numbers = #tpu.dot_dimension_numbers<[1], [0], [0], [1], [0, 0, 1, 1], [], []>} : vector<64x128xbf16>, vector<128x128xbf16>, vector<64x128xf32> -> vector<64x128xf32>
    %7 = arith.addf %3, %6 : vector<64x128xf32>
    %c0_6 = arith.constant 0 : index
    %c0_7 = arith.constant 0 : index
    %8 = vector.load %arg7[%c0_6, %c0_7] : memref<64x128xf32, #tpu.memory_space<vmem>>, vector<64x128xf32>
    tpu.vector_store %arg7[%c0_6, %c0_7], %7 {strides = array<i32>} : memref<64x128xf32, #tpu.memory_space<vmem>>, vector<64x128xf32>,
    %c1_i32 = arith.constant 1 : i32
    %9 = arith.cmpi eq, %arg1, %c1_i32 : i32
    %10 = arith.extui %9 : i1 to i32
    %c0_i32_8 = arith.constant 0 : i32
    %11 = arith.cmpi ne, %10, %c0_i32_8 : i32
    scf.if %11 {
      %c0_9 = arith.constant 0 : index
      %c0_10 = arith.constant 0 : index
      %12 = vector.load %arg7[%c0_9, %c0_10] : memref<64x128xf32, #tpu.memory_space<vmem>>, vector<64x128xf32>
      %cst_11 = arith.constant dense<0.000000e+00> : vector<128xf32>
      %13 = vector.multi_reduction <add>, %12, %cst_11 [0] : vector<64x128xf32> to vector<128xf32>
      %14 = vector.shape_cast %13 : vector<128xf32> to vector<1x128xf32>
      %cst_12 = arith.constant 1.562500e-02 : f32
      %15 = vector.broadcast %cst_12 : f32 to vector<1x128xf32>
      %16 = arith.mulf %14, %15 : vector<1x128xf32>
      %17 = arith.mulf %12, %12 : vector<64x128xf32>
      %cst_13 = arith.constant dense<0.000000e+00> : vector<128xf32>
      %18 = vector.multi_reduction <add>, %17, %cst_13 [0] : vector<64x128xf32> to vector<128xf32>
      %19 = vector.shape_cast %18 : vector<128xf32> to vector<1x128xf32>
      %cst_14 = arith.constant 1.562500e-02 : f32
      %20 = vector.broadcast %cst_14 : f32 to vector<1x128xf32>
      %21 = arith.mulf %19, %20 : vector<1x128xf32>
      %22 = arith.mulf %16, %16 : vector<1x128xf32>
      %23 = arith.subf %21, %22 : vector<1x128xf32>
      %cst_15 = arith.constant 9.99999974E-6 : f32
      %24 = vector.broadcast %cst_15 : f32 to vector<1x128xf32>
      %25 = arith.addf %23, %24 : vector<1x128xf32>
      %26 = math.rsqrt %25 : vector<1x128xf32>
      %27 = vector.broadcast %16 : vector<1x128xf32> to vector<64x128xf32>
      %28 = arith.subf %12, %27 : vector<64x128xf32>
      %c0_16 = arith.constant 0 : index
      %c0_17 = arith.constant 0 : index
      %29 = vector.load %arg4[%c0_16, %c0_17] : memref<1x128xf32, #tpu.memory_space<vmem>>, vector<1x128xf32>
      %30 = arith.mulf %26, %29 : vector<1x128xf32>
      %31 = vector.broadcast %30 : vector<1x128xf32> to vector<64x128xf32>
      %32 = arith.mulf %28, %31 : vector<64x128xf32>
      %c0_18 = arith.constant 0 : index
      %c0_19 = arith.constant 0 : index
      %33 = vector.load %arg5[%c0_18, %c0_19] : memref<1x128xf32, #tpu.memory_space<vmem>>, vector<1x128xf32>
      %34 = vector.broadcast %33 : vector<1x128xf32> to vector<64x128xf32>
      %35 = arith.addf %32, %34 : vector<64x128xf32>
      %cst_20 = arith.constant 0.000000e+00 : f32
      %36 = vector.broadcast %cst_20 : f32 to vector<64x128xf32>
      %37 = arith.maximumf %35, %36 : vector<64x128xf32>
      %38 = arith.truncf %37 : vector<64x128xf32> to vector<64x128xbf16>
      %c0_21 = arith.constant 0 : index
      %c0_22 = arith.constant 0 : index
      %39 = vector.load %arg6[%c0_21, %c0_22] : memref<64x128xbf16, #tpu.memory_space<vmem>>, vector<64x128xbf16>
      tpu.vector_store %arg6[%c0_21, %c0_22], %38 {strides = array<i32>} : memref<64x128xbf16, #tpu.memory_space<vmem>>, vector<64x128xbf16>,
    } else {
    }
    return
  }
  func.func @transform_0(%arg0: i32, %arg1: i32) -> (i32, i32) {
    %c0_i32 = arith.constant 0 : i32
    %c0_i32_0 = arith.constant 0 : i32
    return %c0_i32, %arg1 : i32, i32
  }
  func.func @transform_1(%arg0: i32, %arg1: i32) -> (i32, i32) {
    %c0_i32 = arith.constant 0 : i32
    return %arg1, %arg0 : i32, i32
  }
  func.func @transform_2(%arg0: i32, %arg1: i32) -> (i32, i32) {
    %c0_i32 = arith.constant 0 : i32
    %c0_i32_0 = arith.constant 0 : i32
    return %c0_i32, %arg0 : i32, i32
  }
  func.func @transform_3(%arg0: i32, %arg1: i32) -> (i32, i32) {
    %c0_i32 = arith.constant 0 : i32
    %c0_i32_0 = arith.constant 0 : i32
    return %c0_i32, %arg0 : i32, i32
  }
  func.func @transform_4(%arg0: i32, %arg1: i32) -> (i32, i32) {
    %c0_i32 = arith.constant 0 : i32
    %c0_i32_0 = arith.constant 0 : i32
    return %c0_i32, %arg0 : i32, i32
  }
}

</mosaic_0001>

<bundles_post_ra>
// kernel: tpu_custom_call.1
= control target key start
LH: loop header
LB: loop body
LE: loop exit
PB: predicated region body
PF: predicated region fallthrough
CT: control target
= control target key end

     0   :  { %s1679_s0 = inlined_call_operand.hbm [shape: bf16[64,256], index: 0, kind: input, shape index: {}]   ;;  %s1680_s1 = inlined_call_operand.hbm [shape: bf16[256,256], index: 1, kind: input, shape index: {}]   ;;  %s1681_s2 = inlined_call_operand.hbm [shape: f32[1,256], index: 2, kind: input, shape index: {}]   ;;  %s1682_s3 = inlined_call_operand.vmem [shape: f32[1,256], index: 3, kind: input, shape index: {}]   ;;  %s1683_s4 = inlined_call_operand.hbm [shape: bf16[64,256], index: 4, kind: output, shape index: {}]  }
   0x1   :  { %1689 = sst [smem:[#allocation20_spill]] %s1679_s0 }
   0x2   :  { %1690 = sst [smem:[#allocation21_spill]] %s1680_s1 }
   0x3   :  { %1691 = sst [smem:[#allocation22_spill]] %s1682_s3 }
   0x4   :  { %1692 = sst [smem:[#allocation23_spill]] %s1683_s4 }
   0x5   :  { %9 = vsyncpa [#allocation4], 0 }
   0x6   :  { %11 = vsyncpa [#allocation4 + $0x1], 0 }
   0x7   :  { %12 = vsyncpa [#allocation7], 0 }
   0x8   :  { %14 = vsyncpa [#allocation7 + $0x1], 0 }
   0x9   :  { %15 = vsyncpa [#allocation5], 0 }
   0xa   :  { %17 = vsyncpa [#allocation5 + $0x1], 0  ;;  %s1300_s15 = smov 0   ;;  %s1302_s16 = smov 0  }
   0xb   :  { %s1304_s17 = smov 0   ;;  %s1306_s18 = smov 0  }
   0xc   :  { %s1308_s19 = smov 0   ;;  %s1310_s20 = smov 0  }
   0xd   :  { %s1312_s21 = smov 0   ;;  %s1314_s22 = smov 0  }
   0xe   :  { %s1316_s23 = smov 0   ;;  %s1318_s24 = smov 0  }
   0xf   :  { %s1320_s25 = smov 0   ;;  %s1322_s26 = smov 0  }
  0x10   :  { %s1324_s27 = smov 0   ;;  %s1326_s28 = smov 0  }
  0x11 LB: > { %1693 = sst [smem:[#allocation14_spill]] %s1246_s23  ;;  %s32_s29 = sadd.s32 1, %s1258_s26  ;;  %s1266_s28 = sphi %s1326_s28, %s23_s28   ;;  %s1262_s27 = sphi %s1324_s27, %s1733_s27   ;;  %s1258_s26 = sphi %s1322_s26, %s1721_s26   ;;  %s1254_s25 = sphi %s1320_s25, %s1732_s25   ;;  %s1250_s24 = sphi %s1318_s24, %s1720_s24   ;;  %s1246_s23 = sphi %s1316_s23, %s1719_s23   ;;  %s1242_s22 = sphi %s1314_s22, %s1731_s22   ;;  %s1238_s21 = sphi %s1312_s21, %s1730_s21   ;;  %s1234_s20 = sphi %s1310_s20, %s1729_s20   ;;  %s1230_s19 = sphi %s1308_s19, %s1728_s19   ;;  %s1226_s18 = sphi %s1306_s18, %s1727_s18   ;;  %s1222_s17 = sphi %s1304_s17, %s1726_s17   ;;  %s1218_s16 = sphi %s1302_s16, %s1725_s16   ;;  %s1214_s15 = sphi %s1300_s15, %s1724_s15  }
  0x12   : > { %1694 = sst [smem:[#allocation15_spill]] %s1250_s24  ;;  %p1372_p0 = scmp.ge.s32.totalorder %s32_s29, 2 }
  0x13   : > { %1695 = sst [smem:[#allocation16_spill]] %s1258_s26  ;;  %p50_p1 = scmp.eq.s32.totalorder %s1266_s28, 0 }
  0x14   : > { %p77_p2 = scmp.ne.s32.totalorder %s1234_s20, %s1230_s19  ;;  %s1735_s29 = smov (%p1372_p0, %s32_s29), 0 }
  0x15   : > { %1697 = sst [smem:[#allocation17_spill]] %s1735_s29  ;;  %p83_p4 = scmp.ne.s32.totalorder %s1230_s19, %s1226_s18 }
  0x16   : > { %p1386_p3 = por %p77_p2, %p50_p1  ;;  %s1394_s8 = ssub.s32 %s1258_s26, %s1735_s29 }
  0x17   : > { %p40_p5 = scmp.eq.s32.totalorder %s1394_s8, 0  ;;  %p898_p6 = scmp.lt.s32.totalorder %s1266_s28, 4 }
  0x18   : > { %s206_s9 = sand.u32 1, %s1266_s28   ;;  %s208_s10 = sand.u32 1, %s1234_s20  }
  0x19   : > { %s754_s11 = sshll.u32 %s208_s10, 6  ;;  %s816_s12 = sshll.u32 %s1258_s26, 5 }
  0x1a   : > { %s215_s13 = sadd.s32 %s1262_s27, %s816_s12  ;;  %s210_s6 = scalar_lea.vmem [#allocation6], %s754_s11 }
  0x1b   : > { %s757_s14 = sshll.u32 %s215_s13, 2  ;;  %s220_s30 = sshll.u32 %s210_s6, 4  ;;  %s221_s30 = int_to_ptr.vmem [resolvable:$true] %s220_s30 }
  0x1c   : > { %s1699_s1 = sld [smem:[#allocation21_spill]]  ;;  %p888_p7 = pnand %p898_p6, %p1386_p3 }
  0x1d   : > { %p758_p8 = scmp.ge.s32.totalorder %s1266_s28, 1  ;;  %p251_p9 = scmp.lt.s32.totalorder %s1266_s28, 5 }
  0x1e   : > { %s1411_s6 = scalar_lea.sflag [#allocation7], %s206_s9  ;;  %s1268_s4 = smov 128  }
  0x1f   : > { %s1269_s24 = smov 64   ;;  %s1270_s10 = smov 4  }
  0x20   : > { %p1414_p10 = pnand %p758_p8, %p251_p9  ;;  %p49_p11 = scmp.ne.s32.totalorder %s1246_s23, %s1242_s22 }
  0x21   : > { %p55_p12 = scmp.ne.s32.totalorder %s1242_s22, %s1238_s21  ;;  %s185_s9 = sand.u32 1, %s1246_s23  }
  0x22   : > { %s217_s29 = scalar_lea.hbm %s1699_s1, %s757_s14  ;;  %s753_s12 = sshll.u32 %s1258_s26, 2 }
  0x23   : > { %s218_s3 = sshll.u32 %s217_s29, 4  ;;  %s42_s29 = sadd.s32 1, %s1246_s23  ;;  %s219_s3 = int_to_ptr.hbm [resolvable:$true] %s218_s3 }
  0x24   : > { %890 = dma.hbm_to_vmem [thread:$0]  (!%p888_p7), %s219_s3, 1024, %s221_s30, %s1411_s6, %s1268_s4, %s1269_s24, %s1270_s10  }
  0x25   : > { %s1422_s7 = scalar_select %p40_p5, %s1246_s23, %s42_s29  }
  0x26   : > { %p51_p13 = por %p50_p1, %p49_p11  ;;  %s752_s3 = sshll.u32 %s185_s9, 5 }
  0x27   : > { %1701 = sst [smem:[#allocation18_spill]] %s1422_s7  ;;  %s189_s1 = scalar_lea.vmem [#allocation3], %s752_s3 }
  0x28   : > { %s1702_s0 = sld [smem:[#allocation20_spill]]  ;;  %s196_s26 = sshll.u32 %s189_s1, 4  ;;  %s197_s26 = int_to_ptr.vmem [resolvable:$true] %s196_s26 }
  0x29   : > { %p885_p2 = pnand %p898_p6, %p51_p13  ;;  %s186_s7 = scalar_lea.sflag [#allocation4], %s185_s9 }
  0x2a   : > { %s749_s30 = sadd.s32 4294967294, %s1266_s28   ;;  %s1703_s13 = sadd.s32 1, %s1262_s27 }
  0x2b   : > { %s1737_s13 = smov (!%p1372_p0, %s1703_s13), %s1262_s27  ;;  %p103_p9 = scmp.ne.s32.totalorder %s1222_s17, %s1218_s16 }
  0x2c   : > { %p37_p8 = scmp.ge.s32.totalorder %s1737_s13, 2  ;;  %p109_p0 = scmp.ne.s32.totalorder %s1218_s16, %s1214_s15 }
  0x2d   : > { %p1470_p11 = por %p103_p9, %p50_p1  ;;  %s1710_s9 = sadd.s32 1, %s1234_s20 }
  0x2e   : > { %s193_s14 = scalar_lea.hbm %s1702_s0, %s753_s12  ;;  %s1438_s12 = sadd.s32 4294967295, %s1266_s28  }
  0x2f   : > { %s194_s29 = sshll.u32 %s193_s14, 4  ;;  %p56_p3 = scmp.eq.s32.totalorder %s1438_s12, 0  ;;  %s195_s29 = int_to_ptr.hbm [resolvable:$true] %s194_s29 }
  0x30   : > { %887 = dma.hbm_to_vmem [thread:$0]  (!%p885_p2), %s195_s29, 512, %s197_s26, %s186_s7, %s1268_s4, %s1269_s24, %s1270_s10  }
  0x31   : > { %p1450_p5 = por %p56_p3, %p55_p12  ;;  %p1457_p7 = por %p83_p4, %p56_p3 }
  0x32   : > { %s96_s4 = sadd.s32 1, %s1222_s17  ;;  %s1739_s13 = smov (%p37_p8, %s1737_s13), 0 }
  0x33   : > { %1706 = sst [smem:[#allocation19_spill]] %s1739_s13  ;;  %p1477_p4 = por %p109_p0, %p56_p3 }
  0x34   : > { %s66_s5 = ssub.s32 %s1262_s27, %s1739_s13  ;;  %p159_p12 = scmp.eq.s32.totalorder %s1438_s12, 3 }
  0x35   : > { %s67_s24 = sor.u32 %s66_s5, %s1394_s8  ;;  %p94_p13 = scmp.eq.s32.totalorder %s66_s5, 0 }
  0x36   : > { %p68_p2 = scmp.eq.s32.totalorder %s67_s24, 0  ;;  %p1485_p8 = por %p159_p12, %p103_p9 }
  0x37   : > { %s1490_s7 = scalar_select %p94_p13, %s1222_s17, %s96_s4  }
  0x38   : > { %s1495_s3 = scalar_select %p68_p2, %s1234_s20, %s1710_s9  }
  0x39   : > { %p165_p1 = scmp.eq.s32.totalorder %s749_s30, 3  ;;  %s232_s14 = sand.u32 1, %s1222_s17  }
  0x3a   : > { %s236_s13 = scalar_lea.hbm %s1681_s2, %s1262_s27  ;;  %s233_s24 = scalar_lea.vmem [#allocation8], %s232_s14 }
  0x3b   : > { %p1505_p3 = por %p165_p1, %p109_p0  ;;  %s238_s5 = sshll.u32 %s236_s13, 4  ;;  %s239_s5 = int_to_ptr.hbm [resolvable:$true] %s238_s5 }
  0x3c   : > { %s240_s23 = sshll.u32 %s233_s24, 4  ;;  %p891_p9 = pnand %p898_p6, %p1470_p11  ;;  %s241_s23 = int_to_ptr.vmem [resolvable:$true] %s240_s23 }
  0x3d   : > { %255 = sbr.rel (%p1414_p10) target bundleno = 367 (0x16f), region = 36  ;;  %s257_s0 = sand.u32 (!%p1414_p10), 1, %s1242_s22  }
  0x3e   : > { %893 = dma.hbm_to_vmem [thread:$0]  (!%p891_p9), %s239_s5, 16, %s241_s23, %s1411_s6  }
  0x3f   : > { %s759_s30 = sshll.u32 (!%p1414_p10), %s257_s0, 5  ;;  %s258_s4 = scalar_lea.sflag (!%p1414_p10), [#allocation4], %s257_s0 }
  0x40   : > { %s1517_s9 = scalar_lea.vmem (!%p1414_p10), [#allocation3], %s759_s30 }
  0x42   : > { %1197 = dma.done.wait (%p1450_p5), %s258_s4, 512  }
  0x43   : > { %1199 = vsyncadd (%p1450_p5), %s258_s4, 4294966784  ;;  %s267_s13 = sand.u32 1, %s1438_s12   ;;  %s269_s23 = sand.u32 1, %s1230_s19  }
  0x44   : > { %s760_s6 = sshll.u32 %s269_s23, 6  ;;  %s268_s11 = scalar_lea.sflag [#allocation7], %s267_s13 }
  0x45   : > { %s1525_s18 = scalar_lea.vmem [#allocation6], %s760_s6 }
  0x46   : > { %1201 = dma.done.wait (%p1457_p7), %s268_s11, 1024  }
  0x47   : > { %1203 = vsyncadd (%p1457_p7), %s268_s11, 4294966272  ;;  %s1532_s14 = sand.u32 1, %s1218_s16  }
  0x48   : > { %s280_s1 = scalar_lea.vmem [#allocation8], %s1532_s14 }
  0x49   : > { %1205 = dma.done.wait (%p1477_p4), %s268_s11, 16  }
  0x4a   : > { %1207 = vsyncadd (%p1477_p4), %s268_s11, 4294967280  ;;  %s761_s12 = sshll.u32 %s1532_s14, 5  ;;  %p319_p6 = scmp.lt.s32.totalorder %s1254_s25, 1 }
  0x4b   : > { %s1712_s24 = sld [smem:[#allocation22_spill]]  ;;  %s1548_s30 = scalar_lea.vmem [#allocation9], %s761_s12 }
  0x4c   : > { %s1542_s29 = scalar_select %p319_p6, %s1254_s25, 1 }
  0x4d   : > { %s1713_s4 = sld [smem:[#allocation15_spill]] }
  0x51   : > { %s321_s0 = scalar_lea.vmem %s1712_s24, %s1542_s29 }
  0x53   : > { %p762_p10 = scmp.ne.s32.totalorder %s1713_s4, 0 }
  0x55   : > { %325 = sbr.rel (%p762_p10) target bundleno = 99 (0x63), region = 52 }
  0x5a   : > { %v1271_v0 = vmov 0.0  }
  0x5b   : > { %326 = vst [vmem:[#allocation2 + $0x30] sm:$0xff] %v1271_v0 }
  0x5c   : > { %327 = vst [vmem:[#allocation2] sm:$0xff] %v1271_v0 }
  0x5d   : > { %328 = vst [vmem:[#allocation2 + $0x18] sm:$0xff] %v1271_v0 }
  0x5e   : > { %329 = vst [vmem:[#allocation2 + $0x10] sm:$0xff] %v1271_v0 }
  0x5f   : > { %330 = vst [vmem:[#allocation2 + $0x8] sm:$0xff] %v1271_v0 }
  0x60   : > { %331 = vst [vmem:[#allocation2 + $0x20] sm:$0xff] %v1271_v0 }
  0x61   : > { %332 = vst [vmem:[#allocation2 + $0x28] sm:$0xff] %v1271_v0 }
  0x62   : > { %333 = vst [vmem:[#allocation2 + $0x38] sm:$0xff] %v1271_v0 }
  0x63 PF: > { %v828_v1 = vld [vmem:[%s1525_s18 + $0x38] sm:$0xff]  ;;  %v827_v2 = vld [vmem:[%s1525_s18 + $0x30] sm:$0xff]  ;;  %v826_v3 = vld [vmem:[%s1525_s18 + $0x28] sm:$0xff]  ;;  %s1714_s21 = sld [smem:[#allocation15_spill]] }
  0x64   : > { %438 = vmatpush.bf16.msra.mxu0 %v828_v1  ;;  %852 = vmatpush.bf16.msra.mxu1 %v828_v1  ;;  %v825_v4 = vld [vmem:[%s1525_s18 + $0x20] sm:$0xff]  ;;  %v824_v5 = vld [vmem:[%s1525_s18 + $0x18] sm:$0xff]  ;;  %v823_v6 = vld [vmem:[%s1525_s18 + $0x10] sm:$0xff] }
  0x65   : > { %853 = vmatpush.bf16.msra.mxu2 %v828_v1  ;;  %854 = vmatpush.bf16.msra.mxu3 %v828_v1  ;;  %v822_v7 = vld [vmem:[%s1525_s18 + $0x8] sm:$0xff]  ;;  %v821_v8 = vld [vmem:[%s1525_s18] sm:$0xff]  ;;  %v819_v11 = vld [vmem:[%s1517_s9 + $0x10] sm:$0xff] }
  0x66   : > { %v817_v9 = vld [vmem:[%s1517_s9] sm:$0xff]  ;;  %v818_v10 = vld [vmem:[%s1517_s9 + $0x8] sm:$0xff]  ;;  %v820_v12 = vld [vmem:[%s1517_s9 + $0x18] sm:$0xff] }
  0x67   : > { %v334_v13 = vld [vmem:[#allocation2 + $0x30] sm:$0xff]  ;;  %v336_v14 = vld [vmem:[#allocation2 + $0x18] sm:$0xff]  ;;  %v338_v19 = vld [vmem:[#allocation2 + $0x8] sm:$0xff] }
  0x68   : > { %439 = vmatpush.bf16.msra.mxu0 %v827_v2  ;;  %855 = vmatpush.bf16.msra.mxu1 %v827_v2  ;;  %v340_v20 = vld [vmem:[#allocation2 + $0x28] sm:$0xff]  ;;  %v335_v21 = vld [vmem:[#allocation2] sm:$0xff]  ;;  %v337_v22 = vld [vmem:[#allocation2 + $0x10] sm:$0xff] }
  0x69   : > { %856 = vmatpush.bf16.msra.mxu2 %v827_v2  ;;  %857 = vmatpush.bf16.msra.mxu3 %v827_v2  ;;  %v339_v31 = vld [vmem:[#allocation2 + $0x20] sm:$0xff]  ;;  %v341_v32 = vld [vmem:[#allocation2 + $0x38] sm:$0xff]  ;;  %p811_p5 = scmp.ne.s32.totalorder %s1714_s21, 1 }
  0x6c   : > { %440 = vmatpush.bf16.msra.mxu0 %v826_v3  ;;  %858 = vmatpush.bf16.msra.mxu1 %v826_v3 }
  0x6d   : > { %859 = vmatpush.bf16.msra.mxu2 %v826_v3  ;;  %860 = vmatpush.bf16.msra.mxu3 %v826_v3 }
  0x70   : > { %441 = vmatpush.bf16.msra.mxu0 %v825_v4  ;;  %861 = vmatpush.bf16.msra.mxu1 %v825_v4 }
  0x71   : > { %862 = vmatpush.bf16.msra.mxu2 %v825_v4  ;;  %863 = vmatpush.bf16.msra.mxu3 %v825_v4 }
  0x74   : > { %442 = vmatpush.bf16.msra.mxu0 %v824_v5  ;;  %864 = vmatpush.bf16.msra.mxu1 %v824_v5 }
  0x75   : > { %865 = vmatpush.bf16.msra.mxu2 %v824_v5  ;;  %866 = vmatpush.bf16.msra.mxu3 %v824_v5 }
  0x78   : > { %443 = vmatpush.bf16.msra.mxu0 %v823_v6  ;;  %867 = vmatpush.bf16.msra.mxu1 %v823_v6 }
  0x79   : > { %868 = vmatpush.bf16.msra.mxu2 %v823_v6  ;;  %869 = vmatpush.bf16.msra.mxu3 %v823_v6 }
  0x7c   : > { %444 = vmatpush.bf16.msra.mxu0 %v822_v7  ;;  %870 = vmatpush.bf16.msra.mxu1 %v822_v7 }
  0x7d   : > { %871 = vmatpush.bf16.msra.mxu2 %v822_v7  ;;  %872 = vmatpush.bf16.msra.mxu3 %v822_v7 }
  0x80   : > { %445 = vmatpush.bf16.msra.mxu0 %v821_v8  ;;  %873 = vmatpush.bf16.msra.mxu1 %v821_v8 }
  0x81   : > { %874 = vmatpush.bf16.msra.mxu2 %v821_v8  ;;  %875 = vmatpush.bf16.msra.mxu3 %v821_v8 }
  0x83   : > { %446 = vmatmul.bf16.vlgmr.msra.gmra.mxu0 %v817_v9  ;;  %451 = vmatmul.bf16.vlgmr.msra.gmra.mxu1 %v818_v10 }
  0x84   : > { %456 = vmatmul.bf16.vlgmr.msra.gmra.mxu2 %v819_v11  ;;  %461 = vmatmul.bf16.vlgmr.msra.gmra.mxu3 %v820_v12 }
 0x100   : > { %v447_v15 = vpop.f32.mrf.mxu0  ;;  %v452_v16 = vpop.f32.mrf.mxu1 }
 0x101   : > { %v467_v17 = vadd.f32 %v447_v15, %v334_v13  ;;  %v469_v18 = vadd.f32 %v452_v16, %v336_v14 }
 0x103   : > { %475 = vst [vmem:[#allocation2 + $0x30] sm:$0xff] %v467_v17 }
 0x104   : > { %477 = vst [vmem:[#allocation2 + $0x18] sm:$0xff] %v469_v18 }
 0x107   : > { %v457_v23 = vpop.f32.mrf.mxu2  ;;  %v462_v24 = vpop.f32.mrf.mxu3 }
 0x108   : > { %v471_v25 = vadd.f32 %v457_v23, %v338_v19  ;;  %v473_v26 = vadd.f32 %v462_v24, %v340_v20  ;;  %v449_v27 = vpop.f32.mrf.mxu0  ;;  %v454_v28 = vpop.f32.mrf.mxu1 }
 0x109   : > { %v468_v29 = vadd.f32 %v449_v27, %v335_v21  ;;  %v470_v30 = vadd.f32 %v454_v28, %v337_v22 }
 0x10a   : > { %479 = vst [vmem:[#allocation2 + $0x8] sm:$0xff] %v471_v25 }
 0x10b   : > { %481 = vst [vmem:[#allocation2 + $0x28] sm:$0xff] %v473_v26 }
 0x10c   : > { %476 = vst [vmem:[#allocation2] sm:$0xff] %v468_v29 }
 0x10d   : > { %478 = vst [vmem:[#allocation2 + $0x10] sm:$0xff] %v470_v30 }
 0x10f   : > { %v459_v33 = vpop.f32.mrf.mxu2  ;;  %v464_v34 = vpop.f32.mrf.mxu3  ;;  %486 = sbr.rel (%p811_p5) target bundleno = 345 (0x159), region = 56 }
 0x110   : > { %v472_v35 = vadd.f32 %v459_v33, %v339_v31  ;;  %v474_v36 = vadd.f32 %v464_v34, %v341_v32 }
 0x112   : > { %480 = vst [vmem:[#allocation2 + $0x20] sm:$0xff] %v472_v35 }
 0x113   : > { %482 = vst [vmem:[#allocation2 + $0x38] sm:$0xff] %v474_v36 }
 0x114   : > { %v1564_v37 = vld [vmem:[#allocation2 + $0x30] sm:$0xff]  ;;  %v1566_v38 = vld [vmem:[#allocation2] sm:$0xff]  ;;  %v1568_v39 = vld [vmem:[#allocation2 + $0x18] sm:$0xff] }
 0x115   : > { %v1570_v40 = vld [vmem:[#allocation2 + $0x10] sm:$0xff]  ;;  %v495_v41 = vadd.f32 %v1566_v38, %v1564_v37  ;;  %v509_v42 = vmul.f32 %v1564_v37, %v1564_v37  ;;  %v510_v43 = vmul.f32 %v1566_v38, %v1566_v38  ;;  %v511_v44 = vmul.f32 %v1568_v39, %v1568_v39  ;;  %v1580_v45 = vld [vmem:[#allocation2 + $0x8] sm:$0xff]  ;;  %v552_v26 = vld [vmem:[%s280_s1] sm:$0x1] }
 0x116   : > { %v512_v47 = vmul.f32 %v1570_v40, %v1570_v40  ;;  %v513_v51 = vmul.f32 %v1580_v45, %v1580_v45  ;;  %v493_v53 = vld [vmem:[#allocation2 + $0x28] sm:$0xff] }
 0x117   : > { %v496_v46 = vadd.f32 %v495_v41, %v1568_v39  ;;  %v517_v48 = vadd.f32 %v510_v43, %v509_v42  ;;  %v515_v59 = vmul.f32 %v493_v53, %v493_v53  ;;  %v1019_v42 = vld [vmem:[%s321_s0] ss:$0 sm:$0xff] }
 0x119   : > { %v1585_v49 = vld [vmem:[#allocation2 + $0x20] sm:$0xff]  ;;  %v497_v50 = vadd.f32 %v496_v46, %v1570_v40  ;;  %v518_v52 = vadd.f32 %v517_v48, %v511_v44 }
 0x11a   : > { %v514_v55 = vmul.f32 %v1585_v49, %v1585_v49  ;;  %v494_v57 = vld [vmem:[#allocation2 + $0x38] sm:$0xff] }
 0x11b   : > { %v498_v54 = vadd.f32 %v497_v50, %v1580_v45  ;;  %v519_v56 = vadd.f32 %v518_v52, %v512_v47  ;;  %v516_v62 = vmul.f32 %v494_v57, %v494_v57 }
 0x11d   : > { %v499_v58 = vadd.f32 %v498_v54, %v1585_v49  ;;  %v520_v60 = vadd.f32 %v519_v56, %v513_v51 }
 0x11f   : > { %v500_v61 = vadd.f32 %v499_v58, %v493_v53  ;;  %v521_v63 = vadd.f32 %v520_v60, %v514_v55 }
 0x121   : > { %v501_v0 = vadd.f32 %v500_v61, %v494_v57  ;;  %v522_v1 = vadd.f32 %v521_v63, %v515_v59 }
 0x123   : > { %v502_v2 = vrot.slane %v501_v0, 4  ;;  %v523_v3 = vadd.f32 %v522_v1, %v516_v62 }
 0x125   : > { %v503_v4 = vadd.f32 %v502_v2, %v501_v0  ;;  %v524_v5 = vrot.slane %v523_v3, 4 }
 0x127   : > { %v504_v6 = vrot.slane %v503_v4, 2  ;;  %v525_v7 = vadd.f32 %v524_v5, %v523_v3 }
 0x129   : > { %v505_v8 = vadd.f32 %v504_v6, %v503_v4  ;;  %v526_v9 = vrot.slane %v525_v7, 2 }
 0x12b   : > { %v506_v10 = vrot.slane %v505_v8, 1  ;;  %v527_v11 = vadd.f32 %v526_v9, %v525_v7 }
 0x12d   : > { %v507_v12 = vadd.f32 %v506_v10, %v505_v8  ;;  %v528_v13 = vrot.slane %v527_v11, 1 }
 0x12f   : > { %v508_v14 = vmul.f32 0.015625, %v507_v12  ;;  %v529_v15 = vadd.f32 %v528_v13, %v527_v11 }
 0x131   : > { %v530_v16 = vmul.f32 0.015625, %v529_v15  ;;  %v531_v17 = vmul.f32 %v508_v14, %v508_v14  ;;  %v544_v28 = vsub.f32 %v1564_v37, %v508_v14  ;;  %v545_v29 = vsub.f32 %v1566_v38, %v508_v14 }
 0x132   : > { %v546_v31 = vsub.f32 %v1568_v39, %v508_v14  ;;  %v547_v32 = vsub.f32 %v1570_v40, %v508_v14  ;;  %v548_v33 = vsub.f32 %v1580_v45, %v508_v14  ;;  %v549_v34 = vsub.f32 %v1585_v49, %v508_v14 }
 0x133   : > { %v532_v18 = vsub.f32 %v530_v16, %v531_v17  ;;  %v550_v35 = vsub.f32 %v493_v53, %v508_v14  ;;  %v551_v36 = vsub.f32 %v494_v57, %v508_v14 }
 0x135   : > { %v533_v19 = vadd.f32 1e-05, %v532_v18 }
 0x137   : > { %1020 = vrsqrt.f32 %v533_v19  ;;  %vm540_vm0 = vweird.f32 %v533_v19 }
 0x13d   : > { %v1021_v20 = vpop.eup %1020 }
 0x13e   : > { %v535_v21 = vmul.f32 %v1021_v20, %v533_v19  ;;  %vm541_vm1 = vweird.f32 %v1021_v20 }
 0x13f   : > { %vm542_vm2 = vmor %vm540_vm0, %vm541_vm1 }
 0x140   : > { %v536_v22 = vmul.f32 %v1021_v20, %v535_v21 }
 0x142   : > { %v537_v23 = vmul.f32 0.5, %v536_v22 }
 0x144   : > { %v538_v24 = vsub.f32 1.5, %v537_v23 }
 0x146   : > { %v539_v25 = vmul.f32 %v1021_v20, %v538_v24 }
 0x148   : > { %v543_v27 = vsel %vm542_vm2, %v1021_v20, %v539_v25 }
 0x149   : > { %v553_v30 = vmul.f32 %v552_v26, %v543_v27 }
 0x14b   : > { %v554_v41 = vperm.slane %v553_v30, 0 }
 0x14d   : > { %v555_v37 = vmul.f32 %v554_v41, %v544_v28  ;;  %v556_v43 = vmul.f32 %v554_v41, %v545_v29  ;;  %v557_v38 = vmul.f32 %v554_v41, %v546_v31  ;;  %v558_v44 = vmul.f32 %v554_v41, %v547_v32 }
 0x14e   : > { %v559_v46 = vmul.f32 %v554_v41, %v548_v33  ;;  %v560_v39 = vmul.f32 %v554_v41, %v549_v34  ;;  %v561_v47 = vmul.f32 %v554_v41, %v550_v35  ;;  %v562_v40 = vmul.f32 %v554_v41, %v551_v36 }
 0x14f   : > { %v567_v48 = vadd.f32 %v1019_v42, %v555_v37  ;;  %v568_v45 = vadd.f32 %v1019_v42, %v556_v43  ;;  %v569_v50 = vadd.f32 %v1019_v42, %v557_v38  ;;  %v570_v49 = vadd.f32 %v1019_v42, %v558_v44 }
 0x150   : > { %v571_v51 = vadd.f32 %v1019_v42, %v559_v46  ;;  %v572_v52 = vadd.f32 %v1019_v42, %v560_v39  ;;  %v573_v53 = vadd.f32 %v1019_v42, %v561_v47  ;;  %v574_v54 = vadd.f32 %v1019_v42, %v562_v40 }
 0x151   : > { %v575_v55 = vmax.f32 %v567_v48, 0.0  ;;  %v576_v56 = vmax.f32 %v568_v45, 0.0  ;;  %v577_v57 = vmax.f32 %v569_v50, 0.0  ;;  %v578_v58 = vmax.f32 %v570_v49, 0.0 }
 0x152   : > { %v579_v59 = vmax.f32 %v571_v51, 0.0  ;;  %v580_v60 = vmax.f32 %v572_v52, 0.0  ;;  %v581_v61 = vmax.f32 %v573_v53, 0.0  ;;  %v582_v62 = vmax.f32 %v574_v54, 0.0 }
 0x153   : > { %v832_v63 = vpack.c.bf16 %v576_v56, %v575_v55  ;;  %v837_v0 = vpack.c.bf16 %v578_v58, %v577_v57 }
 0x154   : > { %v842_v1 = vpack.c.bf16 %v580_v60, %v579_v59  ;;  %v847_v2 = vpack.c.bf16 %v582_v62, %v581_v61 }
 0x155   : > { %833 = vst [vmem:[%s1548_s30] sm:$0xff] %v832_v63  }
 0x156   : > { %849 = vst [vmem:[%s1548_s30 + $0x8] sm:$0xff] %v837_v0  }
 0x157   : > { %850 = vst [vmem:[%s1548_s30 + $0x10] sm:$0xff] %v842_v1  }
 0x158   : > { %851 = vst [vmem:[%s1548_s30 + $0x18] sm:$0xff] %v847_v2  }
 0x159 PF: > { %s813_s6 = sshll.u32 %s1254_s25, 2  ;;  %s1716_s1 = sld [smem:[#allocation23_spill]] }
 0x15a   : > { %s611_s29 = sshll.u32 %s1548_s30, 4  ;;  %s600_s5 = scalar_lea.sflag [#allocation5], %s1532_s14  ;;  %s612_s29 = int_to_ptr.vmem [resolvable:$true] %s611_s29 }
 0x15f   : > { %s610_s12 = scalar_lea.hbm %s1716_s1, %s813_s6  ;;  %s1132_s25 = scalar_lea.hbm %s1716_s1, 64 }
 0x160   : > { %s613_s26 = sshll.u32 %s610_s12, 4  ;;  %s614_s26 = int_to_ptr.hbm [resolvable:$true] %s613_s26 }
 0x161   : > { %s1126_s24 = sshra.s32 %s614_s26, 4  ;;  %s1127_s24 = int_to_ptr.hbm [resolvable:$true] %s1126_s24 }
 0x162   : > { %s1128_s0 = scalar_lea.hbm %s1127_s24, 32  ;;  %p1133_p4 = scmp.lt.s32.totalorder %s1127_s24, %s1716_s1 }
 0x163   : > { %p1129_p7 = scmp.ne.s32.totalorder %s1127_s24, %s1128_s0  ;;  %p1134_p12 = scmp.lt.s32.totalorder %s1132_s25, %s1128_s0 }
 0x165   : > { %p1130_p0 = pnand %p1129_p7, %p1485_p8  ;;  %p1135_p13 = por %p1134_p12, %p1133_p4 }
 0x167   : > { %p1131_p11 = pneg %p1130_p0 }
 0x169   : > { %p1136_p2 = pnand %p1135_p13, %p1131_p11 }
 0x16b   : > { %1139 = shalt.err (!%p1136_p2)
}
 0x16c   : > { %s1272_s14 = smov 64   ;;  %s1273_s30 = smov 128  }
 0x16d   : > { %s1274_s23 = smov 4  }
 0x16e   : > { %882 = dma.vmem_to_hbm [thread:$0]  (%p1485_p8), %s612_s29, 512, %s614_s26, %s600_s5, %s1272_s14, %s1273_s30, %s1274_s23  }
 0x16f PF: > { %p899_p1 = scmp.ge.s32.totalorder %s1266_s28, 2  ;;  %s628_s6 = sand.u32 1, %s1214_s15  }
 0x170   : > { %s629_s11 = scalar_lea.sflag [#allocation5], %s628_s6 }
 0x171   : > { %p895_p9 = pnand %p899_p1, %p1505_p3 }
 0x173   : > { %p896_p6 = pneg %p895_p9 }
 0x175   : > { %1209 = dma.done.wait (%p896_p6), %s629_s11, 512  }
 0x176   : > { %1211 = vsyncadd (%p896_p6), %s629_s11, 4294966784  ;;  %s23_s28 = sadd.s32 1, %s1266_s28   ;;  %s1718_s10 = sld [smem:[#allocation14_spill]] }
 0x177   : > { %p1632_p10 = scmp.ge.s32.totalorder %s23_s28, 6   ;;  %s1719_s23 = sld [smem:[#allocation18_spill]] }
 0x178   : > { %s1720_s24 = sld [smem:[#allocation16_spill]]  ;;  %s1724_s15 = smov %s1218_s16 }
 0x179   : > { %s1721_s26 = sld [smem:[#allocation17_spill]]  ;;  %s1725_s16 = smov %s1222_s17 }
 0x17a   : > { %s1722_s8 = sld [smem:[#allocation19_spill]]  ;;  %s1726_s17 = smov %s1490_s7 }
 0x17b   : > { %s1727_s18 = smov %s1230_s19  ;;  %s1728_s19 = smov %s1234_s20 }
 0x17c   : > { %s1729_s20 = smov %s1495_s3  ;;  %s1730_s21 = smov %s1242_s22 }
 0x17d   : > { %s1731_s22 = smov %s1718_s10  ;;  %s1732_s25 = smov %s1262_s27 }
 0x17e   :  { %22 = sbr.rel (!%p1632_p10) target bundleno = 17 (0x11), region = 116 }
 0x180   : > { %s1733_s27 = smov %s1722_s8 }
 0x183   :  { %635 = vsyncpa [#allocation4], 1 }
 0x184   :  { %637 = vsyncpa [#allocation4 + $0x1], 1 }
 0x185   :  { %638 = vsyncpa [#allocation7], 1 }
 0x186   :  { %640 = vsyncpa [#allocation7 + $0x1], 1 }
 0x187   :  { %641 = vsyncpa [#allocation5], 1 }
 0x188   :  { %643 = vsyncpa [#allocation5 + $0x1], 1 }

</bundles_post_ra>
